<compile_context>
chip_gen: v7x
topology: tpu7x:2x2x1
jax: 0.10.0
libtpu: 0.0.40
codegen_flags: <defaults>
</compile_context>

<pallas_src>
import jax
import jax.numpy as jnp
import numpy as np
from jax import lax
from jax.experimental import pallas as pl
from jax.experimental.pallas import tpu as pltpu

_EPS = 1e-8            # matches torch.nn.functional.cosine_similarity default
_LANE = 128
_LANE_CHUNK = 1024     # in-kernel compute chunk along the lane (pixel) axis
_ABS_MAX_TM = 16384    # absolute cap on the lane tile (raised well above 2048)
_STEP_TARGET = 1 << 20 # aim ~1 MiB of HBM traffic per grid step
_SMALL_C = 8           # C <= this -> unrolled VPU path (SMEM scalar weights)
_SMALL_O = 16


def _round_up(a, b):
    return (a + b - 1) // b * b


def _sublane_rows(n, itemsize):
    # second-minor padding granule: 8 rows for 4-byte, 16 for 2-byte, 32 for 1-byte
    return _round_up(n, max(1, 32 // itemsize))


def _vmem_capacity_bytes():
    try:
        return int(pltpu.get_tpu_info().vmem_capacity_bytes)
    except Exception:
        return 64 << 20            # v7x floor (smallest per-TensorCore VMEM)


def _choose_blocks(N, C, O, HW, x_dtype, o_dtype):
    """Pick (nb, tm, vmem_limit): batch fold, lane tile and VMEM request.

    Byte accounting is dtype- and layout-padding aware, and the double
    buffered working set is sized from the actual chip's VMEM capacity.
    """
    xb = jnp.dtype(x_dtype).itemsize
    ob = jnp.dtype(o_dtype).itemsize
    c_rows = _sublane_rows(C, xb)
    o_rows = _sublane_rows(O, ob)
    bpl = c_rows * xb + o_rows * ob          # bytes per lane per batch element

    vmem_cap = _vmem_capacity_bytes()
    # double-buffered working-set budget: ~21 MiB on v7x (64 MiB/TC),
    # 32 MiB on v5e/v6e (128 MiB) -- leaves pipelining headroom everywhere.
    buf_budget = min(32 << 20, vmem_cap // 3)

    # --- lane (pixel) tile ---
    tm_target = _round_up(max(_LANE, _STEP_TARGET // bpl), _LANE)
    tm_budget = max(_LANE, (buf_budget // (2 * bpl)) // _LANE * _LANE)
    tm_cap = min(tm_target, tm_budget, _ABS_MAX_TM)
    if HW <= tm_cap:
        tm = HW                              # full spatial extent: always legal
    else:
        tm = tm_cap
        # mild preference for an exact divisor (avoids the ragged edge block);
        # never shrink the step by more than ~25% chasing divisibility.
        t = tm_cap
        while t >= max(_LANE, (tm_cap * 3) // 4):
            if HW % t == 0:
                tm = t
                break
            t -= _LANE

    per_elem = _round_up(tm, _LANE) * bpl    # step bytes for one batch element

    # --- batch fold (only when one step already covers the whole spatial map) ---
    if HW <= tm:
        nb = max(1, min(N, _STEP_TARGET // max(per_elem, 1)))
        if nb >= N and N > 1:
            nb = max(1, N // 2)              # keep >= 2 grid steps for megacore
        while nb > 1 and N % nb != 0:        # avoid ragged batch-edge blocks
            nb -= 1
        while nb > 1 and 2 * nb * per_elem > buf_budget:
            nb -= 1
    else:
        nb = 1                               # spatial axis already gives >= 2 steps

    # --- VMEM request: cover the working set + headroom, never above 48 MiB ---
    w_bytes = _round_up(O, 8) * _round_up(C, _LANE) * 4
    working_set = 2 * nb * per_elem + w_bytes
    vmem_limit = int(min(48 << 20, max(16 << 20, working_set + (4 << 20))))
    return nb, tm, vmem_limit


def _lane_chunks(total, chunk):
    """Static (start, size) chunks covering [0, total)."""
    out, pos = [], 0
    while pos < total:
        size = min(chunk, total - pos)
        out.append((pos, size))
        pos += size
    return out


def _cosine_kernel_vpu(w_ref, x_ref, o_ref):
    """Small-C path: prototypes as SMEM scalars, unrolled VPU FMAs.

    w_ref: (O, C) f32 in SMEM (pre-normalized, scaler folded in)
    x_ref: (Nb, C, TM) VMEM -- pixels on the lane axis
    o_ref: (Nb, O, TM) VMEM
    """
    nb, C, tm = x_ref.shape
    O = o_ref.shape[1]
    for b in range(nb):
        for start, size in _lane_chunks(tm, _LANE_CHUNK):
            # packed (C, size) tile; square-sum reduced in place -- no
            # per-channel copies are materialized.
            x32 = x_ref[b, :, start:start + size].astype(jnp.float32)
            ss = jnp.sum(x32 * x32, axis=0, keepdims=True)          # (1, size)
            inv = lax.rsqrt(jnp.maximum(ss, _EPS * _EPS))           # EUP slot
            for o in range(O):
                acc = w_ref[o, 0] * x32[0:1, :]
                for c in range(1, C):
                    acc = acc + w_ref[o, c] * x32[c:c + 1, :]
                # direct per-row store -- no stacked temporary / concatenate
                o_ref[b, o:o + 1, start:start + size] = (
                    acc * inv).astype(o_ref.dtype)


def _cosine_kernel_mxu(w_ref, x_ref, o_ref):
    """General path: f32 MXU dot (under-filled MXU is fine: HBM-bound).

    w_ref: (O, C) f32 VMEM (resident across the grid, pre-normalized + scaled)
    x_ref: (Nb, C, TM) VMEM, o_ref: (Nb, O, TM) VMEM
    """
    nb, _, tm = x_ref.shape
    w = w_ref[...]
    for b in range(nb):
        for start, size in _lane_chunks(tm, _LANE_CHUNK):
            x32 = x_ref[b, :, start:start + size].astype(jnp.float32)  # (C, size)
            ss = jnp.sum(x32 * x32, axis=0, keepdims=True)              # (1, size)
            inv = lax.rsqrt(jnp.maximum(ss, _EPS * _EPS))
            dots = lax.dot_general(w, x32, (((1,), (0,)), ((), ())),
                                   preferred_element_type=jnp.float32)  # (O, size)
            o_ref[b, :, start:start + size] = (dots * inv).astype(o_ref.dtype)


def metric_layer_forward(x_nchw, weight, scaler=1.0):
    """Pallas equivalent of MetricLayer.forward (cosine metric).

    x_nchw: (N, C, H, W); weight: (O, C) prototypes.  Returns (N, O, H, W).
    """
    N, C, H, W = x_nchw.shape
    O = weight.shape[0]
    HW = H * W
    out_dtype = x_nchw.dtype

    # One-time prototype normalization with the scaler folded in (hoisted out
    # of the grid body).  Kept in f32 on both paths for better numerics; the
    # kernel is HBM-bound so the extra f32 MXU passes are free.
    w32 = weight.astype(jnp.float32)
    w_norm = jnp.sqrt(jnp.sum(w32 * w32, axis=1, keepdims=True))
    w_hat = w32 / jnp.maximum(w_norm, _EPS) * jnp.float32(scaler)

    # FREE reshape: NCHW -> (N, C, H*W).  Pixels become the lane axis.
    x_flat = x_nchw.reshape(N, C, HW)

    # Tiny feature maps: pad the pixel axis to 128 once so output stores stay
    # lane-dense (unmasked vst).  Padded lanes compute finite zeros and are
    # sliced off below.
    HW_k = HW
    if HW < _LANE:
        HW_k = _LANE
        x_flat = jnp.pad(x_flat, ((0, 0), (0, 0), (0, HW_k - HW)))

    nb, tm, vmem_limit = _choose_blocks(N, C, O, HW_k, x_flat.dtype, out_dtype)
    grid = (pl.cdiv(N, nb), pl.cdiv(HW_k, tm))

    if C <= _SMALL_C and O <= _SMALL_O:
        kernel = _cosine_kernel_vpu
        w_spec = pl.BlockSpec(memory_space=pltpu.MemorySpace.SMEM)
    else:
        kernel = _cosine_kernel_mxu
        w_spec = pl.BlockSpec((O, C), lambda n, m: (0, 0))   # resident in VMEM

    out_flat = pl.pallas_call(
        kernel,
        out_shape=jax.ShapeDtypeStruct((N, O, HW_k), out_dtype),
        grid_spec=pltpu.PrefetchScalarGridSpec(
            num_scalar_prefetch=0,
            grid=grid,
            in_specs=[
                w_spec,
                pl.BlockSpec((nb, C, tm), lambda n, m: (n, 0, m)),
            ],
            out_specs=pl.BlockSpec((nb, O, tm), lambda n, m: (n, 0, m)),
        ),
        compiler_params=pltpu.CompilerParams(
            dimension_semantics=("parallel", "parallel"),
            vmem_limit_bytes=vmem_limit),
    )(w_hat, x_flat)

    if HW_k != HW:
        out_flat = out_flat[:, :, :HW]
    # FREE reshape back to (N, O, H, W), matching the PyTorch layout exactly.
    return out_flat.reshape(N, O, H, W)


def _xavier_uniform(key, out_channels, in_channels, gain=1.0):
    # nn.init.xavier_uniform_ on a (out, in) matrix: fan_in = in, fan_out = out.
    bound = gain * np.sqrt(6.0 / (in_channels + out_channels))
    return jax.random.uniform(
        key, (out_channels, in_channels), jnp.float32, -bound, bound)


def _reference(x_nchw, weight, scaler=1.0):
    # Pure-JAX reference replicating torch cosine_similarity semantics.
    x = x_nchw.astype(jnp.float32)
    w = weight.astype(jnp.float32)
    dots = jnp.einsum("nchw,oc->nohw", x, w)
    x_norm = jnp.sqrt(jnp.sum(x * x, axis=1, keepdims=True))      # (N,1,H,W)
    w_norm = jnp.sqrt(jnp.sum(w * w, axis=1))                     # (O,)
    denom = (jnp.maximum(x_norm, _EPS)
             * jnp.maximum(w_norm, _EPS)[None, :, None, None])
    return dots / denom * scaler


if __name__ == "__main__":
    key = jax.random.PRNGKey(0)
    k_x, k_w, k_x2, k_w2, k_x3, k_w3 = jax.random.split(key, 6)

    # --- module defaults: C=4, O=2 (small-C / VPU path, lane-dense 16x16 map) ---
    N, C, H, W = 2, 4, 16, 16
    out_channels = 2
    x = jax.random.normal(k_x, (N, C, H, W), jnp.float32)
    weight = _xavier_uniform(k_w, out_channels, C)

    out = jax.block_until_ready(metric_layer_forward(x, weight))
    np.testing.assert_allclose(np.asarray(out), np.asarray(_reference(x, weight)),
                               rtol=1e-5, atol=1e-5)
    assert out.shape == (N, out_channels, H, W)

    # --- larger C, tiny 8x8 map (MXU path + HW<128 lane padding), scaler=20 ---
    C2, H2, W2 = 64, 8, 8
    x2 = jax.random.normal(k_x2, (N, C2, H2, W2), jnp.float32)
    weight2 = _xavier_uniform(k_w2, out_channels, C2)

    out2 = jax.block_until_ready(metric_layer_forward(x2, weight2, scaler=20.0))
    np.testing.assert_allclose(np.asarray(out2),
                               np.asarray(_reference(x2, weight2, scaler=20.0)),
                               rtol=1e-4, atol=1e-4)
    assert out2.shape == (N, out_channels, H2, W2)

    # --- batch-folded path: N=8 folds Nb=4 batch elements per grid step ---
    N3 = 8
    x3 = jax.random.normal(k_x3, (N3, C, H, W), jnp.float32)
    weight3 = _xavier_uniform(k_w3, out_channels, C)

    out3 = jax.block_until_ready(metric_layer_forward(x3, weight3))
    np.testing.assert_allclose(np.asarray(out3),
                               np.asarray(_reference(x3, weight3)),
                               rtol=1e-5, atol=1e-5)
    assert out3.shape == (N3, out_channels, H, W)

    print("KERNEL_OK")
</pallas_src>

<mosaic_0001>
module attributes {stable_mosaic.version = 11 : i64} {
  func.func @_cosine_kernel_vpu(%arg0: i32, %arg1: i32, %arg2: memref<2x4xf32, #tpu.memory_space<smem>>, %arg3: memref<1x4x256xf32, #tpu.memory_space<vmem>>, %arg4: memref<1x2x256xf32, #tpu.memory_space<vmem>>) attributes {dimension_semantics = [#tpu.dimension_semantics<parallel>, #tpu.dimension_semantics<parallel>], iteration_bounds = array<i64: 2, 1>, scalar_prefetch = 0 : i64, scratch_operands = 0 : i64, tpu.core_type = #tpu.core_type<tc>, window_params = [{transform_indices = @transform_0, window_bounds = array<i64: 2, 4>}, {transform_indices = @transform_1, window_bounds = array<i64: 1, 4, 256>}, {transform_indices = @transform_2, window_bounds = array<i64: 1, 2, 256>}]} {
    %c0 = arith.constant 0 : index
    %c0_0 = arith.constant 0 : index
    %c0_1 = arith.constant 0 : index
    %0 = vector.load %arg3[%c0, %c0_0, %c0_1] : memref<1x4x256xf32, #tpu.memory_space<vmem>>, vector<1x4x256xf32>
    %1 = vector.shape_cast %0 : vector<1x4x256xf32> to vector<4x256xf32>
    %2 = arith.mulf %1, %1 : vector<4x256xf32>
    %cst = arith.constant dense<0.000000e+00> : vector<256xf32>
    %3 = vector.multi_reduction <add>, %2, %cst [0] : vector<4x256xf32> to vector<256xf32>
    %4 = vector.shape_cast %3 : vector<256xf32> to vector<1x256xf32>
    %cst_2 = arith.constant 1.000000e-16 : f32
    %5 = vector.broadcast %cst_2 : f32 to vector<1x256xf32>
    %6 = arith.maximumf %4, %5 : vector<1x256xf32>
    %7 = math.rsqrt %6 : vector<1x256xf32>
    %c0_3 = arith.constant 0 : index
    %c0_4 = arith.constant 0 : index
    %8 = memref.load %arg2[%c0_3, %c0_4] : memref<2x4xf32, #tpu.memory_space<smem>>
    %9 = vector.extract_strided_slice %1 {offsets = [0, 0], sizes = [1, 256], strides = [1, 1]} : vector<4x256xf32> to vector<1x256xf32>
    %10 = vector.broadcast %8 : f32 to vector<1x256xf32>
    %11 = arith.mulf %10, %9 : vector<1x256xf32>
    %c0_5 = arith.constant 0 : index
    %c1 = arith.constant 1 : index
    %12 = memref.load %arg2[%c0_5, %c1] : memref<2x4xf32, #tpu.memory_space<smem>>
    %13 = vector.extract_strided_slice %1 {offsets = [1, 0], sizes = [1, 256], strides = [1, 1]} : vector<4x256xf32> to vector<1x256xf32>
    %14 = vector.broadcast %12 : f32 to vector<1x256xf32>
    %15 = arith.mulf %14, %13 : vector<1x256xf32>
    %16 = arith.addf %11, %15 : vector<1x256xf32>
    %c0_6 = arith.constant 0 : index
    %c2 = arith.constant 2 : index
    %17 = memref.load %arg2[%c0_6, %c2] : memref<2x4xf32, #tpu.memory_space<smem>>
    %18 = vector.extract_strided_slice %1 {offsets = [2, 0], sizes = [1, 256], strides = [1, 1]} : vector<4x256xf32> to vector<1x256xf32>
    %19 = vector.broadcast %17 : f32 to vector<1x256xf32>
    %20 = arith.mulf %19, %18 : vector<1x256xf32>
    %21 = arith.addf %16, %20 : vector<1x256xf32>
    %c0_7 = arith.constant 0 : index
    %c3 = arith.constant 3 : index
    %22 = memref.load %arg2[%c0_7, %c3] : memref<2x4xf32, #tpu.memory_space<smem>>
    %23 = vector.extract_strided_slice %1 {offsets = [3, 0], sizes = [1, 256], strides = [1, 1]} : vector<4x256xf32> to vector<1x256xf32>
    %24 = vector.broadcast %22 : f32 to vector<1x256xf32>
    %25 = arith.mulf %24, %23 : vector<1x256xf32>
    %26 = arith.addf %21, %25 : vector<1x256xf32>
    %27 = arith.mulf %26, %7 : vector<1x256xf32>
    %c0_8 = arith.constant 0 : index
    %c0_9 = arith.constant 0 : index
    %c0_10 = arith.constant 0 : index
    %28 = vector.load %arg4[%c0_8, %c0_9, %c0_10] : memref<1x2x256xf32, #tpu.memory_space<vmem>>, vector<1x1x256xf32>
    %29 = vector.shape_cast %28 : vector<1x1x256xf32> to vector<1x256xf32>
    %30 = vector.shape_cast %27 : vector<1x256xf32> to vector<1x1x256xf32>
    tpu.vector_store %arg4[%c0_8, %c0_9, %c0_10], %30 {strides = array<i32>} : memref<1x2x256xf32, #tpu.memory_space<vmem>>, vector<1x1x256xf32>,
    %c1_11 = arith.constant 1 : index
    %c0_12 = arith.constant 0 : index
    %31 = memref.load %arg2[%c1_11, %c0_12] : memref<2x4xf32, #tpu.memory_space<smem>>
    %32 = vector.extract_strided_slice %1 {offsets = [0, 0], sizes = [1, 256], strides = [1, 1]} : vector<4x256xf32> to vector<1x256xf32>
    %33 = vector.broadcast %31 : f32 to vector<1x256xf32>
    %34 = arith.mulf %33, %32 : vector<1x256xf32>
    %c1_13 = arith.constant 1 : index
    %c1_14 = arith.constant 1 : index
    %35 = memref.load %arg2[%c1_13, %c1_14] : memref<2x4xf32, #tpu.memory_space<smem>>
    %36 = vector.extract_strided_slice %1 {offsets = [1, 0], sizes = [1, 256], strides = [1, 1]} : vector<4x256xf32> to vector<1x256xf32>
    %37 = vector.broadcast %35 : f32 to vector<1x256xf32>
    %38 = arith.mulf %37, %36 : vector<1x256xf32>
    %39 = arith.addf %34, %38 : vector<1x256xf32>
    %c1_15 = arith.constant 1 : index
    %c2_16 = arith.constant 2 : index
    %40 = memref.load %arg2[%c1_15, %c2_16] : memref<2x4xf32, #tpu.memory_space<smem>>
    %41 = vector.extract_strided_slice %1 {offsets = [2, 0], sizes = [1, 256], strides = [1, 1]} : vector<4x256xf32> to vector<1x256xf32>
    %42 = vector.broadcast %40 : f32 to vector<1x256xf32>
    %43 = arith.mulf %42, %41 : vector<1x256xf32>
    %44 = arith.addf %39, %43 : vector<1x256xf32>
    %c1_17 = arith.constant 1 : index
    %c3_18 = arith.constant 3 : index
    %45 = memref.load %arg2[%c1_17, %c3_18] : memref<2x4xf32, #tpu.memory_space<smem>>
    %46 = vector.extract_strided_slice %1 {offsets = [3, 0], sizes = [1, 256], strides = [1, 1]} : vector<4x256xf32> to vector<1x256xf32>
    %47 = vector.broadcast %45 : f32 to vector<1x256xf32>
    %48 = arith.mulf %47, %46 : vector<1x256xf32>
    %49 = arith.addf %44, %48 : vector<1x256xf32>
    %50 = arith.mulf %49, %7 : vector<1x256xf32>
    %c0_19 = arith.constant 0 : index
    %c1_20 = arith.constant 1 : index
    %c0_21 = arith.constant 0 : index
    %51 = vector.load %arg4[%c0_19, %c1_20, %c0_21] : memref<1x2x256xf32, #tpu.memory_space<vmem>>, vector<1x1x256xf32>
    %52 = vector.shape_cast %51 : vector<1x1x256xf32> to vector<1x256xf32>
    %53 = vector.shape_cast %50 : vector<1x256xf32> to vector<1x1x256xf32>
    tpu.vector_store %arg4[%c0_19, %c1_20, %c0_21], %53 {strides = array<i32>} : memref<1x2x256xf32, #tpu.memory_space<vmem>>, vector<1x1x256xf32>,
    return
  }
  func.func @transform_0(%arg0: i32, %arg1: i32) -> (i32, i32) {
    %c0_i32 = arith.constant 0 : i32
    %c0_i32_0 = arith.constant 0 : i32
    %c0_i32_1 = arith.constant 0 : i32
    return %c0_i32, %c0_i32_0 : i32, i32
  }
  func.func @transform_1(%arg0: i32, %arg1: i32) -> (i32, i32, i32) {
    %c0_i32 = arith.constant 0 : i32
    %c0_i32_0 = arith.constant 0 : i32
    return %arg0, %c0_i32, %arg1 : i32, i32, i32
  }
  func.func @transform_2(%arg0: i32, %arg1: i32) -> (i32, i32, i32) {
    %c0_i32 = arith.constant 0 : i32
    %c0_i32_0 = arith.constant 0 : i32
    return %arg0, %c0_i32, %arg1 : i32, i32, i32
  }
}

</mosaic_0001>

<bundles_post_ra>
// kernel: tpu_custom_call.1
= control target key start
LH: loop header
LB: loop body
LE: loop exit
PB: predicated region body
PF: predicated region fallthrough
CT: control target
= control target key end

     0   :  { %7 = vsyncpa [#allocation5], 0  ;;  %s916_s0 = inlined_call_operand.hbm [shape: f32[2,4], index: 0, kind: input, shape index: {}]   ;;  %s917_s1 = inlined_call_operand.hbm [shape: f32[2,4,256], index: 1, kind: input, shape index: {}]   ;;  %s918_s2 = inlined_call_operand.hbm [shape: f32[2,2,256], index: 2, kind: output, shape index: {}]  }
   0x1   :  { %8 = vsyncpa [#allocation3], 0 }
   0x2   :  { %10 = vsyncpa [#allocation3 + $0x1], 0 }
   0x3   :  { %11 = vsyncpa [#allocation4], 0 }
   0x4   :  { %13 = vsyncpa [#allocation4 + $0x1], 0  ;;  %s689_s9 = smov 0   ;;  %s691_s10 = smov 0  }
   0x5   :  { %s693_s11 = smov 0   ;;  %s695_s12 = smov 0  }
   0x6   :  { %s697_s13 = smov 0   ;;  %s699_s14 = smov 0  }
   0x7 LB: > { %s428_s15 = sadd.s32 4294967295, %s668_s14   ;;  %s429_s16 = sadd.s32 4294967294, %s668_s14   ;;  %s668_s14 = sphi %s699_s14, %s19_s14   ;;  %s664_s13 = sphi %s697_s13, %s942_s13   ;;  %s660_s12 = sphi %s695_s12, %s941_s12   ;;  %s656_s11 = sphi %s693_s11, %s940_s11   ;;  %s652_s10 = sphi %s691_s10, %s939_s10   ;;  %s648_s9 = sphi %s689_s9, %s938_s9  }
   0x8   : > { %p74_p0 = scmp.ne.s32.totalorder %s652_s10, %s648_s9  ;;  %p723_p1 = scmp.eq.s32.totalorder %s428_s15, 0 }
   0x9   : > { %p727_p2 = scmp.eq.s32.totalorder %s428_s15, 1  ;;  %p106_p3 = scmp.eq.s32.totalorder %s429_s16, 1 }
   0xa   : > { %s923_s17 = scalar_select %p723_p1, 1, 0 }
   0xb   : > { %p733_p4 = por %p723_p1, %p74_p0  ;;  %p430_p5 = scmp.ge.s32.totalorder %s668_s14, 1 }
   0xc   : > { %p738_p6 = por %p106_p3, %p74_p0  ;;  %p113_p7 = scmp.lt.s32.totalorder %s668_s14, 3 }
   0xd   : > { %s925_s19 = scalar_select %p733_p4, 1, 0 }
   0xe   : > { %s926_s20 = scalar_select %p738_p6, 1, 0 }
   0xf   : > { %p743_p8 = pnand %p430_p5, %p113_p7  ;;  %s31_s22 = sadd.s32 1, %s664_s13 }
  0x10   : > { %p757_p12 = scmp.ge.s32.totalorder %s31_s22, 2  ;;  %s61_s25 = sadd.s32 1, %s656_s11 }
  0x11   : > { %p469_p10 = pneg %p743_p8  ;;  %p68_p13 = scmp.ne.s32.totalorder %s656_s11, %s652_s10 }
  0x12   : > { %p69_p0 = scmp.eq.s32.totalorder %s668_s14, 0  ;;  %s539_s28 = scalar_lea.hbm %s916_s0, 32 }
  0x13   : > { %p753_p11 = pnand %p469_p10, %p723_p1  ;;  %p540_p3 = scmp.ne.s32.totalorder %s916_s0, %s539_s28 }
  0x14   : > { %p546_p9 = scmp.lt.u32.totalorder %s539_s28, %s916_s0 }
  0x15   : > { %p541_p5 = pneg %p753_p11 }
  0x17   : > { %p542_p7 = pnand %p541_p5, %p540_p3 }
  0x19   : > { %p543_p10 = pneg %p542_p7 }
  0x1b   : > { %p548_p6 = pnand %p546_p9, %p543_p10 }
  0x1d   : > { %551 = shalt.err (!%p548_p6)
}
  0x1e   : > { %s670_s5 = smov [#allocation2]   ;;  %s944_s22 = smov (%p757_p12, %s31_s22), 0 }
  0x1f   : > { %472 = dma.hbm_to_smem (!%p753_p11), %s916_s0, 32, %s670_s5, [#allocation5]  }
  0x20   : > { %p788_p6 = por %p69_p0, %p68_p13  ;;  %p797_p9 = por %p727_p2, %p68_p13 }
  0x21   : > { %s56_s16 = ssub.s32 %s664_s13, %s944_s22  ;;  %p482_p3 = scmp.lt.s32.totalorder %s668_s14, 2 }
  0x22   : > { %s931_s15 = scalar_select %p797_p9, 1, 0 }
  0x23   : > { %p59_p5 = scmp.eq.s32.totalorder %s56_s16, 0  ;;  %s135_s23 = sand.u32 1, %s656_s11  }
  0x24   : > { %s433_s24 = sshll.u32 %s135_s23, 3  ;;  %s459_s27 = sshll.u32 %s664_s13, 7 }
  0x25   : > { %s806_s26 = scalar_select %p59_p5, %s656_s11, %s61_s25  }
  0x26   : > { %s812_s30 = scalar_lea.hbm %s917_s1, %s459_s27  ;;  %s139_s18 = scalar_lea.vmem [#allocation6], %s433_s24 }
  0x27   : > { %s149_s3 = sshll.u32 %s139_s18, 4  ;;  %p818_p2 = pnand %p482_p3, %p788_p6  ;;  %s814_s3 = int_to_ptr.vmem [resolvable:$true] %s149_s3 }
  0x28   : > { %s136_s25 = scalar_lea.sflag [#allocation3], %s135_s23  ;;  %s552_s5 = scalar_lea.hbm %s812_s30, 128 }
  0x29   : > { %p553_p11 = scmp.ne.s32.totalorder %s812_s30, %s552_s5  ;;  %p554_p12 = pneg %p818_p2 }
  0x2a   : > { %s557_s16 = scalar_lea.hbm %s917_s1, 256  ;;  %p558_p7 = scmp.lt.u32.totalorder %s812_s30, %s917_s1 }
  0x2b   : > { %p555_p13 = pnand %p554_p12, %p553_p11  ;;  %p559_p10 = scmp.lt.u32.totalorder %s557_s16, %s552_s5 }
  0x2c   : > { %p561_p3 = scmp.lt.u32.totalorder %s552_s5, %s812_s30 }
  0x2d   : > { %p556_p0 = pneg %p555_p13  ;;  %p560_p6 = por %p559_p10, %p558_p7 }
  0x2f   : > { %p562_p5 = por %p561_p3, %p560_p6 }
  0x31   : > { %p563_p9 = pnand %p562_p5, %p556_p0 }
  0x33   : > { %566 = shalt.err (!%p563_p9)
}
  0x34   : > { %s567_s23 = scalar_lea.vmem %s814_s3, 128  ;;  %s671_s27 = smov [#allocation6]  }
  0x35   : > { %p568_p11 = scmp.ne.s32.totalorder %s814_s3, %s567_s23  ;;  %s572_s28 = sshll.u32 %s671_s27, 4  ;;  %s573_s28 = int_to_ptr.vmem [resolvable:$false] %s572_s28 }
  0x36   : > { %s574_s29 = scalar_lea.vmem %s573_s28, 256  ;;  %p575_p1 = scmp.lt.s32.totalorder %s814_s3, %s573_s28 }
  0x37   : > { %p570_p13 = pnand %p568_p11, %p554_p12  ;;  %p576_p7 = scmp.lt.s32.totalorder %s574_s29, %s567_s23 }
  0x39   : > { %p571_p4 = pneg %p570_p13  ;;  %p577_p10 = por %p576_p7, %p575_p1 }
  0x3b   : > { %p578_p6 = pnand %p577_p10, %p571_p4 }
  0x3d   : > { %581 = shalt.err (!%p578_p6)
}
  0x3e   : > { %476 = dma.hbm_to_vmem [thread:$0]  (!%p818_p2), %s812_s30, 128, %s814_s3, %s136_s25  }
  0x3f   : > { %158 = sbr.rel (%p743_p8) target bundleno = 130 (0x82), region = 28  ;;  %p933_p9 = scmp.ne.s32.totalorder (!%p743_p8), %s923_s17, 0 }
  0x46   : > { %635 = dma.done.wait (%p933_p9), [#allocation5], 32  }
  0x47   : > { %637 = vsyncadd (%p933_p9), [#allocation5], 4294967264  ;;  %s854_s18 = sand.u32 1, %s652_s10   ;;  %p934_p1 = scmp.ne.s32.totalorder %s925_s19, 0 }
  0x48   : > { %s438_s5 = sshll.u32 %s854_s18, 3  ;;  %s165_s4 = scalar_lea.sflag [#allocation3], %s854_s18 }
  0x49   : > { %s168_s6 = scalar_lea.vmem [#allocation6], %s438_s5 }
  0x4a   : > { %639 = dma.done.wait (%p934_p1), %s165_s4, 128  }
  0x4b   : > { %641 = vsyncadd (%p934_p1), %s165_s4, 4294967168 }
  0x4c   : > { %173 = sfence }
  0x4d   : > { %v192_v0 = vld [vmem:[%s168_s6] sm:$0xff]  ;;  %vm197_vm0 = vcmask 1043456   ;;  %s440_s17 = sld [smem:[#allocation2 + $0x1]]  ;;  %s216_s21 = sld [smem:[#allocation2]]  ;;  %v672_v41 = vmov 1966171168   ;;  %v252_v43 = vlaneseq }
  0x4e   : > { %v193_v1 = vmul.f32 %v192_v0, %v192_v0  ;;  %s447_s30 = sld [smem:[#allocation2 + $0x81]]  ;;  %s442_s3 = sld [smem:[#allocation2 + $0x2]]  ;;  %v250_v42 = vunpack.c.l.s4 %v672_v41 }
  0x4f   : > { %s446_s25 = sld [smem:[#allocation2 + $0x80]]  ;;  %s449_s7 = sld [smem:[#allocation2 + $0x82]]  ;;  %v253_v49 = vshrl.u32 %v252_v43, 7  ;;  %vm266_vm1 = vcmp.lt.s32.totalorder %v252_v43, 256 }
  0x50   : > { %v195_v2 = vcombine.high %v193_v1, %v193_v1  ;;  %v198_v3 = vsel %vm197_vm0, %v193_v1, 0.0  ;;  %s444_s19 = sld [smem:[#allocation2 + $0x3]]  ;;  %s439_s8 = sshll.u32 %s854_s18, 2  ;;  %v251_v48 = vunpack.c.0.s8 %v250_v42 }
  0x51   : > { %v199_v4 = vrot.slane %v198_v3, 4  ;;  %s451_s16 = sld [smem:[#allocation2 + $0x83]]  ;;  %s189_s24 = scalar_lea.vmem [#allocation7], %s439_s8 }
  0x52   : > { %v205_v5 = vsel %vm197_vm0, %v195_v2, 0.0  ;;  %v254_v55 = vsub.s32 %v251_v48, %v253_v49  ;;  %s332_s23 = sshll.u32 %s189_s24, 4  ;;  %s460_s27 = sshll.u32 %s660_s12, 6  ;;  %s864_s23 = int_to_ptr.vmem [resolvable:$true] %s332_s23 }
  0x53   : > { %v200_v6 = vadd.f32 %v199_v4, %v198_v3  ;;  %v206_v7 = vrot.slane %v205_v5, 4  ;;  %v220_v12 = vstv %s440_s17  ;;  %v217_v16 = vstv %s216_s21  ;;  %s869_s5 = scalar_lea.hbm %s918_s2, %s460_s27  ;;  %s316_s4 = scalar_lea.sflag [#allocation4], %s854_s18 }
  0x54   : > { %v273_v13 = vstv %s447_s30  ;;  %v221_v17 = vmul.f32 %v220_v12, %v192_v0  ;;  %v228_v18 = vstv %s442_s3  ;;  %v218_v24 = vmul.f32 %v217_v16, %v192_v0  ;;  %s582_s6 = scalar_lea.vmem %s864_s23, 64  ;;  %p935_p8 = scmp.ne.s32.totalorder %s931_s15, 0 }
  0x55   : > { %v201_v8 = vrot.slane %v200_v6, 2  ;;  %v207_v9 = vadd.f32 %v206_v7, %v205_v5  ;;  %v274_v19 = vmul.f32 %v273_v13, %v192_v0  ;;  %v270_v22 = vstv %s446_s25  ;;  %p583_p4 = scmp.ne.s32.totalorder %s864_s23, %s582_s6  ;;  %s673_s12 = smov [#allocation7]  }
  0x56   : > { %v281_v23 = vstv %s449_s7  ;;  %v229_v27 = vmul.f32 %v228_v18, %v192_v0  ;;  %v236_v28 = vstv %s444_s19  ;;  %v441_v29 = vrot.slane %v221_v17, 9  ;;  %s586_s17 = sshll.u32 %s673_s12, 4  ;;  %s587_s17 = int_to_ptr.vmem [resolvable:$false] %s586_s17 }
  0x57   : > { %v202_v10 = vadd.f32 %v201_v8, %v200_v6  ;;  %v208_v11 = vrot.slane %v207_v9, 2  ;;  %v271_v30 = vmul.f32 %v270_v22, %v192_v0  ;;  %v448_v31 = vrot.slane %v274_v19, 9  ;;  %p584_p2 = pnand %p583_p4, %p935_p8  ;;  %s588_s21 = scalar_lea.vmem %s587_s17, 128 }
  0x58   : > { %v282_v32 = vmul.f32 %v281_v23, %v192_v0  ;;  %v289_v34 = vstv %s451_s16  ;;  %v443_v35 = vrot.slane %v229_v27, 10  ;;  %v237_v36 = vmul.f32 %v236_v28, %v192_v0  ;;  %p589_p0 = scmp.lt.s32.totalorder %s864_s23, %s587_s17  ;;  %p590_p3 = scmp.lt.s32.totalorder %s588_s21, %s582_s6 }
  0x59   : > { %v203_v14 = vrot.slane %v202_v10, 1  ;;  %v209_v15 = vadd.f32 %v208_v11, %v207_v9  ;;  %v226_v37 = vadd.f32 %v441_v29, %v218_v24  ;;  %v279_v38 = vadd.f32 %v448_v31, %v271_v30  ;;  %p585_p12 = pneg %p584_p2 }
  0x5a   : > { %v450_v39 = vrot.slane %v282_v32, 10  ;;  %v290_v40 = vmul.f32 %v289_v34, %v192_v0  ;;  %v445_v45 = vrot.slane %v237_v36, 11  ;;  %p591_p5 = por %p590_p3, %p589_p0 }
  0x5b   : > { %v204_v20 = vadd.f32 %v203_v14, %v202_v10  ;;  %v210_v21 = vrot.slane %v209_v15, 1  ;;  %v234_v44 = vadd.f32 %v443_v35, %v226_v37 }
  0x5c   : > { %v287_v46 = vadd.f32 %v450_v39, %v279_v38  ;;  %v452_v47 = vrot.slane %v290_v40, 11  ;;  %p592_p11 = pnand %p591_p5, %p585_p12 }
  0x5d   : > { %v211_v25 = vadd.f32 %v210_v21, %v209_v15  ;;  %v212_v26 = vmax.f32 %v204_v20, 1e-16  ;;  %v242_v51 = vadd.f32 %v445_v45, %v234_v44 }
  0x5e   : > { %v295_v52 = vadd.f32 %v452_v47, %v287_v46 }
  0x5f   : > { %v213_v33 = vmax.f32 %v211_v25, 1e-16  ;;  %535 = vrsqrt.f32 %v212_v26 }
  0x61   : > { %537 = vrsqrt.f32 %v213_v33 }
  0x69   : > { %v536_v50 = vpop.eup %535 }
  0x6b   : > { %v538_v53 = vpop.eup %537 }
  0x6c   : > { %v245_v54 = vcombine.low %v536_v50, %v538_v53 }
  0x6e   : > { %v247_v56 = vmul.f32 %v245_v54, %v242_v51  ;;  %v296_v57 = vmul.f32 %v295_v52, %v245_v54 }
  0x70   : > { %v255_v58 = vrot.slane %v247_v56, %v254_v55  ;;  %v304_v59 = vrot.slane %v296_v57, %v254_v55 }
  0x72   : > { %v262_v60 = vrot.slane %v255_v58, %v254_v55  ;;  %v311_v61 = vrot.slane %v304_v59, %v254_v55 }
  0x74   : > { %268 = vst.msk [vmem:[%s189_s24] ss:$2 sm:$0x3] %vm266_vm1, %v262_v60  ;;  %453 = vst.msk [vmem:[%s189_s24 + $0x1] ss:$2 sm:$0x3] %vm266_vm1, %v311_v61 }
  0x75   : > { %595 = shalt.err (!%p592_p11)
}
  0x76   : > { %s596_s18 = scalar_lea.hbm %s869_s5, 64  ;;  %s600_s25 = scalar_lea.hbm %s918_s2, 128 }
  0x77   : > { %p597_p13 = scmp.ne.s32.totalorder %s869_s5, %s596_s18  ;;  %p601_p6 = scmp.lt.u32.totalorder %s869_s5, %s918_s2 }
  0x78   : > { %p602_p9 = scmp.lt.u32.totalorder %s600_s25, %s596_s18  ;;  %p604_p4 = scmp.lt.u32.totalorder %s596_s18, %s869_s5 }
  0x79   : > { %p598_p7 = pnand %p597_p13, %p935_p8 }
  0x7a   : > { %p603_p1 = por %p602_p9, %p601_p6 }
  0x7b   : > { %p599_p10 = pneg %p598_p7 }
  0x7c   : > { %p605_p2 = por %p604_p4, %p603_p1 }
  0x7e   : > { %p606_p12 = pnand %p605_p2, %p599_p10 }
  0x80   : > { %609 = shalt.err (!%p606_p12)
}
  0x81   : > { %467 = dma.vmem_to_hbm [thread:$0]  (%p935_p8), %s864_s23, 64, %s869_s5, %s316_s4  }
  0x82 PF: > { %s344_s16 = sand.u32 1, %s648_s9   ;;  %p936_p0 = scmp.ne.s32.totalorder %s926_s20, 0 }
  0x83   : > { %p937_p3 = scmp.ge.s32.totalorder %s668_s14, 2  ;;  %s345_s8 = scalar_lea.sflag [#allocation4], %s344_s16 }
  0x85   : > { %p478_p5 = pnand %p937_p3, %p936_p0 }
  0x87   : > { %643 = dma.done.wait (!%p478_p5), %s345_s8, 64  }
  0x88   : > { %645 = vsyncadd (!%p478_p5), %s345_s8, 4294967232  ;;  %s19_s14 = sadd.s32 1, %s668_s14   ;;  %s938_s9 = smov %s652_s10 }
  0x89   : > { %p16_p11 = scmp.ge.s32.totalorder %s19_s14, 4   ;;  %s939_s10 = smov %s656_s11 }
  0x8a   : > { %s940_s11 = smov %s806_s26  ;;  %s941_s12 = smov %s664_s13 }
  0x8b   : > { %s942_s13 = smov %s944_s22  ;;  %18 = sbr.rel (!%p16_p11) target bundleno = 7 (0x7), region = 79 }
  0x92   :  { %350 = vsyncpa [#allocation3], 1 }
  0x93   :  { %352 = vsyncpa [#allocation3 + $0x1], 1 }
  0x94   :  { %353 = vsyncpa [#allocation4], 1 }
  0x95   :  { %355 = vsyncpa [#allocation4 + $0x1], 1 }
  0x96   :  { %356 = vsyncpa [#allocation5], 1 }
  0x97   :  { %358 = vsyncpa [#allocation5 + $0x1], 1 }

</bundles_post_ra>
